<compile_context>
chip_gen: v7x
topology: tpu7x:2x2x1
jax: 0.10.0
libtpu: 0.0.40
codegen_flags: <defaults>
</compile_context>

<pallas_src>
import functools

import jax
import jax.numpy as jnp
from jax.experimental import pallas as pl
from jax.experimental.pallas import tpu as pltpu


def _round_up(x, m):
    return ((x + m - 1) // m) * m


def _vmem_plan():
    """(working-set budget, vmem_limit_bytes) keyed off VMEM capacity."""
    cap = None
    try:
        info = pltpu.get_tpu_info()
        cap = getattr(info, "vmem_capacity_bytes", None)
    except Exception:
        cap = None
    if not cap:
        cap = 64 * 1024 * 1024
    if cap <= 64 * 1024 * 1024:          # v7x-class TensorCore (64 MiB VMEM)
        return 20 * 1024 * 1024, 48 * 1024 * 1024
    # v5e / v6e (128 MiB VMEM): bigger tiles, raised scoped limit.
    return 44 * 1024 * 1024, 100 * 1024 * 1024


# ----------------------------- Pallas kernels ------------------------------


def _fused_ce_acc_kernel(logits_ref, labels_ref, acc_ref, *, true_b, class_axis):
    """One batch block: accumulate CE-loss sum (sublane 0) + correct count
    (sublane 1) into a grid-resident (1, 8, 128) f32 accumulator.

    class_axis==0: logits_ref (C, TB), labels_ref (1, TB)   [lane-dense batch]
    class_axis==1: logits_ref (TB, C), labels_ref (TB, 1)   [row-major fallback]
    """
    batch_axis = 1 - class_axis
    p = pl.program_id(0)
    i = pl.program_id(1)
    n_i = pl.num_programs(1)

    @pl.when(i == 0)
    def _init():
        acc_ref[...] = jnp.zeros_like(acc_ref)

    logits = logits_ref[...].astype(jnp.float32)     # per-tile f32 upcast
    labels = labels_ref[...]
    c = logits.shape[class_axis]
    tb = logits.shape[batch_axis]

    # Mask batch positions of the (possibly partial) last block.  NOTE: keep
    # this as a jnp.where *select*; a multiplicative mask would propagate the
    # NaN/Inf that block padding can produce.
    base = (p * n_i + i) * tb
    bpos = jax.lax.broadcasted_iota(jnp.int32, labels.shape, batch_axis)
    valid = (base + bpos) < true_b

    # Gather the label logit via a one-hot select (no class padding needed).
    cls = jax.lax.broadcasted_iota(jnp.int32, logits.shape, class_axis)
    picked = jnp.sum(jnp.where(cls == labels, logits, 0.0),
                     axis=class_axis, keepdims=True)

    # Numerically stable logsumexp over the class axis.
    m = jnp.max(logits, axis=class_axis, keepdims=True)
    lse = m + jnp.log(jnp.sum(jnp.exp(logits - m), axis=class_axis, keepdims=True))
    loss_v = jnp.where(valid, lse - picked, 0.0)

    # In-kernel argmax (first max index, same as jnp.argmax) + accuracy.
    idx_of_max = jnp.where(logits == m, cls, jnp.int32(c))
    pred = jnp.min(idx_of_max, axis=class_axis, keepdims=True)
    correct = jnp.where(valid & (pred == labels), 1.0, 0.0)

    loss_s = jnp.sum(loss_v)
    corr_s = jnp.sum(correct)
    sub = jax.lax.broadcasted_iota(jnp.int32, acc_ref.shape, len(acc_ref.shape) - 2)
    acc_ref[...] += (jnp.where(sub == 0, loss_s, 0.0)
                     + jnp.where(sub == 1, corr_s, 0.0))


def _accuracy_kernel(pred_ref, label_ref, acc_ref, *, true_b):
    """Grid-tiled correct-count into an (8,128) resident accumulator."""
    i = pl.program_id(0)

    @pl.when(i == 0)
    def _init():
        acc_ref[...] = jnp.zeros_like(acc_ref)

    tb = pred_ref.shape[-1]
    lane = jax.lax.broadcasted_iota(jnp.int32, pred_ref.shape, 1)
    valid = (i * tb + lane) < true_b
    eq = jnp.where(valid & (pred_ref[...] == label_ref[...]), 1.0, 0.0)
    acc_ref[...] += jnp.sum(eq)


# ------------------------------- JAX wrappers -------------------------------


def pallas_loss_and_accuracy(logits, labels, *, layout=None, tb=None):
    """logits: (..., C), labels: (...) int -> (mean CE loss, accuracy), f32."""
    c = logits.shape[-1]
    logits2 = logits.reshape(-1, c)                  # keep native dtype (bf16 ok)
    labels1 = labels.reshape(-1).astype(jnp.int32)
    b = logits2.shape[0]
    dtype = logits2.dtype
    itemsize = jnp.dtype(dtype).itemsize

    if layout is None:
        # Few-shot regime (small class count) -> lane-dense transposed layout.
        layout = "transposed" if c <= 512 else "row"
    transposed = layout == "transposed"
    budget, vmem_limit = _vmem_plan()

    # --- padding-aware per-batch-element VMEM footprint ---------------------
    if transposed:
        pack = 128                                   # batch axis = lane axis
        sub_pack = 8 * max(1, 4 // itemsize)         # sublane pack of dtype
        c_in_pad = _round_up(c, sub_pack)
        c_f32_pad = _round_up(c, 8)
        per_batch = (2 * (c_in_pad * itemsize + 8 * 4)   # dbl-buffered logits+labels
                     + 3 * c_f32_pad * 4 + 48)           # in-kernel f32 temporaries
    else:
        pack = 8 * max(1, 4 // itemsize)             # batch axis = sublane axis
        c_lane_pad = _round_up(c, 128)
        per_batch = (2 * (c_lane_pad * itemsize + 128 * 4)
                     + 3 * c_lane_pad * 4 + 64)

    if tb is None:
        tb = budget // max(per_batch, 1)
        tb_cap = (1 << 17) if transposed else 8192   # keep row-major tiles modest (v5e)
        tb = max(pack, min(tb_cap, tb))
        # Guarantee >= 2 blocks for big problems so both v7x TCs get work.
        if b * c * itemsize > (2 << 20) and b > 2 * pack:
            tb = min(tb, _round_up(pl.cdiv(b, 2), pack))
    if tb >= b:
        tb = b
    else:
        tb = max(pack, (tb // pack) * pack)
    g = pl.cdiv(b, tb)

    # Split the block axis as (parallel P, arbitrary G2) only when it divides
    # evenly (no out-of-range block indices, no clamping needed).
    P, G2 = 1, g
    if g >= 2:
        if g % 2 and tb < b:
            tb2 = _round_up(pl.cdiv(b, g + 1), pack)
            if tb2 < b and pl.cdiv(b, tb2) % 2 == 0:
                tb = tb2
                g = pl.cdiv(b, tb)
        if g % 2 == 0:
            P, G2 = 2, g // 2

    kernel = functools.partial(_fused_ce_acc_kernel, true_b=b,
                               class_axis=0 if transposed else 1)

    if transposed:
        logits_in = logits2.T                        # (C, B): lane-dense batch
        labels_in = labels1.reshape(1, b)
        logits_spec = pl.BlockSpec((c, tb), lambda p, i, G2=G2: (0, p * G2 + i))
        labels_spec = pl.BlockSpec((1, tb), lambda p, i, G2=G2: (0, p * G2 + i))
    else:
        logits_in = logits2
        labels_in = labels1.reshape(b, 1)
        logits_spec = pl.BlockSpec((tb, c), lambda p, i, G2=G2: (p * G2 + i, 0))
        labels_spec = pl.BlockSpec((tb, 1), lambda p, i, G2=G2: (p * G2 + i, 0))

    cost = pl.CostEstimate(
        flops=8 * b * c,
        transcendentals=b * (c + 1),
        bytes_accessed=b * c * itemsize + b * 4 + P * 8 * 128 * 4,
    )

    parts = pl.pallas_call(
        kernel,
        out_shape=jax.ShapeDtypeStruct((P, 8, 128), jnp.float32),
        grid=(P, G2),
        in_specs=[logits_spec, labels_spec],
        out_specs=pl.BlockSpec((1, 8, 128), lambda p, i: (p, 0, 0)),
        compiler_params=pltpu.CompilerParams(
            dimension_semantics=("parallel", "arbitrary"),
            vmem_limit_bytes=vmem_limit),
        cost_estimate=cost,
    )(logits_in, labels_in)

    loss = jnp.sum(parts[:, 0, 0]) / b
    acc = jnp.sum(parts[:, 1, 0]) / b
    return loss, acc


def pallas_cross_entropy_loss(logits, labels, **kw):
    """Mean cross-entropy loss (nn.CrossEntropyLoss equivalent)."""
    loss, _ = pallas_loss_and_accuracy(logits, labels, **kw)
    return loss


def pallas_accuracy(pred, label, tb=None):
    """pred, label: any shape int -> scalar f32 accuracy."""
    pred1 = pred.reshape(1, -1).astype(jnp.int32)
    label1 = label.reshape(1, -1).astype(jnp.int32)
    b = pred1.shape[-1]

    budget, vmem_limit = _vmem_plan()
    if tb is None:
        # 2 int32 arrays, double-buffered, 1->8 sublane padding.
        tb = budget // (2 * 2 * 8 * 4)
        tb = max(128, min(tb, 1 << 16))
    if tb >= b:
        tb = b
        g = 1
    else:
        tb = max(128, (tb // 128) * 128)
        g = pl.cdiv(b, tb)

    out = pl.pallas_call(
        functools.partial(_accuracy_kernel, true_b=b),
        out_shape=jax.ShapeDtypeStruct((8, 128), jnp.float32),
        grid=(g,),
        in_specs=[pl.BlockSpec((1, tb), lambda i: (0, i)),
                  pl.BlockSpec((1, tb), lambda i: (0, i))],
        out_specs=pl.BlockSpec((8, 128), lambda i: (0, 0)),
        compiler_params=pltpu.CompilerParams(
            dimension_semantics=("arbitrary",),
            vmem_limit_bytes=vmem_limit),
    )(pred1, label1)
    return out[0, 0] / b


# --------------------------------- Module -----------------------------------


class FewShotREModel:
    """JAX/Pallas port of the PyTorch FewShotREModel base class."""

    def __init__(self, sentence_encoder=None):
        self.sentence_encoder = sentence_encoder
        # self.cost == nn.CrossEntropyLoss -> fused Pallas CE kernel
        self.cost = pallas_cross_entropy_loss

    def forward(self, support, query, N, K, Q):
        # TODO(synk): forward is abstract in the reference module (subclasses
        # define it), so there is nothing to port here.
        raise NotImplementedError

    def loss(self, logits, label):
        n = logits.shape[-1]
        return self.cost(logits.reshape(-1, n), label.reshape(-1))

    def accuracy(self, pred, label):
        return pallas_accuracy(pred.reshape(-1), label.reshape(-1))

    def loss_and_accuracy(self, logits, label):
        # Fused single pass over logits: CE loss + in-kernel argmax accuracy.
        return pallas_loss_and_accuracy(logits, label)


# ---------------------------------- main ------------------------------------

if __name__ == "__main__":
    key = jax.random.PRNGKey(0)
    k1, k2, k3, k4 = jax.random.split(key, 4)

    model = FewShotREModel(sentence_encoder=None)

    def ref_loss_acc(logits, label):
        c = logits.shape[-1]
        fl = logits.reshape(-1, c).astype(jnp.float32)
        lb = label.reshape(-1)
        logp = jax.nn.log_softmax(fl, axis=-1)
        loss = -jnp.mean(logp[jnp.arange(fl.shape[0]), lb])
        pr = jnp.argmax(fl, axis=-1)
        acc = jnp.mean((pr == lb).astype(jnp.float32))
        return loss, acc

    # --- small few-shot episode: N=5 classes, Q=3 queries/class, 1 episode --
    N, K, Q = 5, 1, 3
    total_q = N * Q
    logits = jax.random.normal(k1, (1, total_q, N), dtype=jnp.float32)
    label = jax.random.randint(k2, (1, total_q), 0, N, dtype=jnp.int32)
    pred = jnp.argmax(logits, axis=-1).astype(jnp.int32)

    ref_loss, ref_acc = ref_loss_acc(logits, label)
    loss_val = jax.block_until_ready(model.loss(logits, label))
    acc_val = jax.block_until_ready(model.accuracy(pred, label))
    f_loss, f_acc = jax.block_until_ready(model.loss_and_accuracy(logits, label))
    assert jnp.allclose(loss_val, ref_loss, atol=1e-5, rtol=1e-5), (loss_val, ref_loss)
    assert jnp.allclose(acc_val, ref_acc, atol=1e-6), (acc_val, ref_acc)
    assert jnp.allclose(f_loss, ref_loss, atol=1e-5, rtol=1e-5), (f_loss, ref_loss)
    assert jnp.allclose(f_acc, ref_acc, atol=1e-6), (f_acc, ref_acc)

    # --- multi-block grid: partial last block + 2-way parallel axis ---------
    B2, C2 = 1000, 7
    logits2 = jax.random.normal(k3, (B2, C2), dtype=jnp.float32)
    label2 = jax.random.randint(k4, (B2,), 0, C2, dtype=jnp.int32)
    rl2, ra2 = ref_loss_acc(logits2, label2)

    t_loss, t_acc = jax.block_until_ready(
        pallas_loss_and_accuracy(logits2, label2, layout="transposed", tb=384))
    assert jnp.allclose(t_loss, rl2, atol=1e-4, rtol=1e-5), (t_loss, rl2)
    assert jnp.allclose(t_acc, ra2, atol=1e-6), (t_acc, ra2)

    r_loss, r_acc = jax.block_until_ready(
        pallas_loss_and_accuracy(logits2, label2, layout="row", tb=256))
    assert jnp.allclose(r_loss, rl2, atol=1e-4, rtol=1e-5), (r_loss, rl2)
    assert jnp.allclose(r_acc, ra2, atol=1e-6), (r_acc, ra2)

    # Standalone grid-tiled accuracy kernel on the bigger batch.
    pred2 = jnp.argmax(logits2, axis=-1).astype(jnp.int32)
    acc2 = jax.block_until_ready(pallas_accuracy(pred2, label2, tb=256))
    assert jnp.allclose(acc2, ra2, atol=1e-6), (acc2, ra2)

    # --- bf16 logits stay bf16 on the wire; per-tile f32 upcast in-kernel ---
    logits_bf16 = logits.astype(jnp.bfloat16)
    ref_loss16, _ = ref_loss_acc(logits_bf16, label)
    b_loss = jax.block_until_ready(model.loss(logits_bf16, label))
    assert jnp.allclose(b_loss, ref_loss16, atol=1e-5, rtol=1e-5), (b_loss, ref_loss16)

    print("KERNEL_OK")
</pallas_src>

<mosaic_0001>
module attributes {stable_mosaic.version = 11 : i64} {
  func.func @_fused_ce_acc_kernel(%arg0: i32, %arg1: i32, %arg2: memref<5x15xf32, #tpu.memory_space<vmem>>, %arg3: memref<1x15xi32, #tpu.memory_space<vmem>>, %arg4: memref<1x8x128xf32, #tpu.memory_space<vmem>>) attributes {dimension_semantics = [#tpu.dimension_semantics<parallel>, #tpu.dimension_semantics<arbitrary>], iteration_bounds = array<i64: 1, 1>, scalar_prefetch = 0 : i64, scratch_operands = 0 : i64, tpu.core_type = #tpu.core_type<tc>, window_params = [{transform_indices = @transform_0, window_bounds = array<i64: 5, 15>}, {transform_indices = @transform_1, window_bounds = array<i64: 1, 15>}, {transform_indices = @transform_2, window_bounds = array<i64: 1, 8, 128>}]} {
    %c0_i32 = arith.constant 0 : i32
    %0 = arith.cmpi eq, %arg1, %c0_i32 : i32
    %1 = arith.extui %0 : i1 to i32
    %c0_i32_0 = arith.constant 0 : i32
    %2 = arith.cmpi ne, %1, %c0_i32_0 : i32
    scf.if %2 {
      %cst_24 = arith.constant 0.000000e+00 : f32
      %66 = vector.broadcast %cst_24 : f32 to vector<1x8x128xf32>
      %c0_25 = arith.constant 0 : index
      %c0_26 = arith.constant 0 : index
      %c0_27 = arith.constant 0 : index
      %67 = vector.load %arg4[%c0_25, %c0_26, %c0_27] : memref<1x8x128xf32, #tpu.memory_space<vmem>>, vector<1x8x128xf32>
      tpu.vector_store %arg4[%c0_25, %c0_26, %c0_27], %66 {strides = array<i32>} : memref<1x8x128xf32, #tpu.memory_space<vmem>>, vector<1x8x128xf32>,
    } else {
    }
    %c0 = arith.constant 0 : index
    %c0_1 = arith.constant 0 : index
    %3 = vector.load %arg2[%c0, %c0_1] : memref<5x15xf32, #tpu.memory_space<vmem>>, vector<5x15xf32>
    %c0_2 = arith.constant 0 : index
    %c0_3 = arith.constant 0 : index
    %4 = vector.load %arg3[%c0_2, %c0_3] : memref<1x15xi32, #tpu.memory_space<vmem>>, vector<1x15xi32>
    %c1_i32 = arith.constant 1 : i32
    %5 = arith.muli %arg0, %c1_i32 : i32
    %6 = arith.addi %5, %arg1 : i32
    %c15_i32 = arith.constant 15 : i32
    %7 = arith.muli %6, %c15_i32 : i32
    %8 = tpu.iota {dimensions = array<i32: 1>} : vector<1x15xi32>
    %9 = vector.broadcast %7 : i32 to vector<1x15xi32>
    %10 = arith.addi %9, %8 : vector<1x15xi32>
    %c15_i32_4 = arith.constant 15 : i32
    %11 = vector.broadcast %c15_i32_4 : i32 to vector<1x15xi32>
    %12 = arith.cmpi slt, %10, %11 : vector<1x15xi32>
    %13 = tpu.iota {dimensions = array<i32: 0>} : vector<5x15xi32>
    %14 = vector.broadcast %4 : vector<1x15xi32> to vector<5x15xi32>
    %15 = arith.cmpi eq, %13, %14 : vector<5x15xi32>
    %cst = arith.constant 0.000000e+00 : f32
    %16 = vector.broadcast %cst : f32 to vector<5x15xf32>
    %17 = arith.select %15, %3, %16 : vector<5x15xi1>, vector<5x15xf32>
    %cst_5 = arith.constant dense<0.000000e+00> : vector<15xf32>
    %18 = vector.multi_reduction <add>, %17, %cst_5 [0] : vector<5x15xf32> to vector<15xf32>
    %19 = vector.shape_cast %18 : vector<15xf32> to vector<1x15xf32>
    %cst_6 = arith.constant dense<0xFF800000> : vector<15xf32>
    %20 = vector.multi_reduction <maximumf>, %3, %cst_6 [0] : vector<5x15xf32> to vector<15xf32>
    %21 = vector.shape_cast %20 : vector<15xf32> to vector<1x15xf32>
    %22 = vector.broadcast %21 : vector<1x15xf32> to vector<5x15xf32>
    %23 = arith.subf %3, %22 : vector<5x15xf32>
    %24 = math.exp %23 : vector<5x15xf32>
    %cst_7 = arith.constant dense<0.000000e+00> : vector<15xf32>
    %25 = vector.multi_reduction <add>, %24, %cst_7 [0] : vector<5x15xf32> to vector<15xf32>
    %26 = vector.shape_cast %25 : vector<15xf32> to vector<1x15xf32>
    %27 = math.log %26 : vector<1x15xf32>
    %28 = arith.addf %21, %27 : vector<1x15xf32>
    %29 = arith.subf %28, %19 : vector<1x15xf32>
    %cst_8 = arith.constant 0.000000e+00 : f32
    %30 = vector.broadcast %cst_8 : f32 to vector<1x15xf32>
    %31 = arith.select %12, %29, %30 : vector<1x15xi1>, vector<1x15xf32>
    %32 = vector.broadcast %21 : vector<1x15xf32> to vector<5x15xf32>
    %33 = arith.cmpf oeq, %3, %32 : vector<5x15xf32>
    %c5_i32 = arith.constant 5 : i32
    %34 = vector.broadcast %c5_i32 : i32 to vector<5x15xi32>
    %35 = arith.select %33, %13, %34 : vector<5x15xi1>, vector<5x15xi32>
    %cst_9 = arith.constant dense<2147483647> : vector<15xi32>
    %36 = vector.multi_reduction <minsi>, %35, %cst_9 [0] : vector<5x15xi32> to vector<15xi32>
    %37 = vector.shape_cast %36 : vector<15xi32> to vector<1x15xi32>
    %38 = arith.cmpi eq, %37, %4 : vector<1x15xi32>
    %39 = arith.andi %12, %38 : vector<1x15xi1>
    %cst_10 = arith.constant 1.000000e+00 : f32
    %cst_11 = arith.constant 0.000000e+00 : f32
    %40 = vector.broadcast %cst_10 : f32 to vector<1x15xf32>
    %41 = vector.broadcast %cst_11 : f32 to vector<1x15xf32>
    %42 = arith.select %39, %40, %41 : vector<1x15xi1>, vector<1x15xf32>
    %43 = vector.shape_cast %31 : vector<1x15xf32> to vector<1x1x15xf32>
    %cst_12 = arith.constant dense<0.000000e+00> : vector<1xf32>
    %44 = vector.multi_reduction <add>, %43, %cst_12 [1, 2] : vector<1x1x15xf32> to vector<1xf32>
    %45 = vector.shape_cast %44 : vector<1xf32> to vector<1x1x1xf32>
    %46 = vector.extract %45[0, 0, 0] : f32 from vector<1x1x1xf32>
    %47 = vector.shape_cast %42 : vector<1x15xf32> to vector<1x1x15xf32>
    %cst_13 = arith.constant dense<0.000000e+00> : vector<1xf32>
    %48 = vector.multi_reduction <add>, %47, %cst_13 [1, 2] : vector<1x1x15xf32> to vector<1xf32>
    %49 = vector.shape_cast %48 : vector<1xf32> to vector<1x1x1xf32>
    %50 = vector.extract %49[0, 0, 0] : f32 from vector<1x1x1xf32>
    %51 = tpu.iota {dimensions = array<i32: 1>} : vector<1x8x128xi32>
    %c0_14 = arith.constant 0 : index
    %c0_15 = arith.constant 0 : index
    %c0_16 = arith.constant 0 : index
    %52 = vector.load %arg4[%c0_14, %c0_15, %c0_16] : memref<1x8x128xf32, #tpu.memory_space<vmem>>, vector<1x8x128xf32>
    %c0_i32_17 = arith.constant 0 : i32
    %53 = vector.broadcast %c0_i32_17 : i32 to vector<1x8x128xi32>
    %54 = arith.cmpi eq, %51, %53 : vector<1x8x128xi32>
    %cst_18 = arith.constant 0.000000e+00 : f32
    %55 = vector.broadcast %46 : f32 to vector<1x8x128xf32>
    %56 = vector.broadcast %cst_18 : f32 to vector<1x8x128xf32>
    %57 = arith.select %54, %55, %56 : vector<1x8x128xi1>, vector<1x8x128xf32>
    %c1_i32_19 = arith.constant 1 : i32
    %58 = vector.broadcast %c1_i32_19 : i32 to vector<1x8x128xi32>
    %59 = arith.cmpi eq, %51, %58 : vector<1x8x128xi32>
    %cst_20 = arith.constant 0.000000e+00 : f32
    %60 = vector.broadcast %50 : f32 to vector<1x8x128xf32>
    %61 = vector.broadcast %cst_20 : f32 to vector<1x8x128xf32>
    %62 = arith.select %59, %60, %61 : vector<1x8x128xi1>, vector<1x8x128xf32>
    %63 = arith.addf %57, %62 : vector<1x8x128xf32>
    %64 = arith.addf %52, %63 : vector<1x8x128xf32>
    %c0_21 = arith.constant 0 : index
    %c0_22 = arith.constant 0 : index
    %c0_23 = arith.constant 0 : index
    %65 = vector.load %arg4[%c0_21, %c0_22, %c0_23] : memref<1x8x128xf32, #tpu.memory_space<vmem>>, vector<1x8x128xf32>
    tpu.vector_store %arg4[%c0_21, %c0_22, %c0_23], %64 {strides = array<i32>} : memref<1x8x128xf32, #tpu.memory_space<vmem>>, vector<1x8x128xf32>,
    return
  }
  func.func @transform_0(%arg0: i32, %arg1: i32) -> (i32, i32) {
    %c1_i32 = arith.constant 1 : i32
    %0 = arith.muli %arg0, %c1_i32 : i32
    %1 = arith.addi %0, %arg1 : i32
    %c0_i32 = arith.constant 0 : i32
    %c0_i32_0 = arith.constant 0 : i32
    return %c0_i32, %1 : i32, i32
  }
  func.func @transform_1(%arg0: i32, %arg1: i32) -> (i32, i32) {
    %c1_i32 = arith.constant 1 : i32
    %0 = arith.muli %arg0, %c1_i32 : i32
    %1 = arith.addi %0, %arg1 : i32
    %c0_i32 = arith.constant 0 : i32
    %c0_i32_0 = arith.constant 0 : i32
    return %c0_i32, %1 : i32, i32
  }
  func.func @transform_2(%arg0: i32, %arg1: i32) -> (i32, i32, i32) {
    %c0_i32 = arith.constant 0 : i32
    %c0_i32_0 = arith.constant 0 : i32
    %c0_i32_1 = arith.constant 0 : i32
    return %arg0, %c0_i32, %c0_i32_0 : i32, i32, i32
  }
}

</mosaic_0001>

<bundles_post_ra>
// kernel: tpu_custom_call.1
= control target key start
LH: loop header
LB: loop body
LE: loop exit
PB: predicated region body
PF: predicated region fallthrough
CT: control target
= control target key end

     0   :  { %7 = vsyncpa [#allocation3], 0  ;;  %s273_s0 = inlined_call_operand.hbm [shape: f32[5,15], index: 0, kind: input, shape index: {}]   ;;  %s274_s1 = inlined_call_operand.vmem [shape: s32[1,15], index: 1, kind: input, shape index: {}]   ;;  %s275_s2 = inlined_call_operand.hbm [shape: f32[1,8,128], index: 2, kind: output, shape index: {}]  }
   0x1   :  { %8 = vsyncpa [#allocation4], 0  ;;  %s217_s9 = smov [#allocation2]   ;;  %s169_s13 = scalar_lea.hbm %s273_s0, 128 }
   0x2   :  { %s18_s10 = sshll.u32 %s217_s9, 4  ;;  %p170_p0 = scmp.ne.s32.totalorder %s273_s0, %s169_s13  ;;  %s19_s10 = int_to_ptr.vmem [resolvable:$true] %s18_s10 }
   0x3   :  { %p173_p1 = scmp.lt.u32.totalorder %s169_s13, %s273_s0 }
   0x5   :  { %p175_p2 = pnand %p173_p1, %p170_p0 }
   0x7   :  { %178 = shalt.err (!%p175_p2)
}
   0x8   :  { %s179_s18 = scalar_lea.vmem %s19_s10, 128  ;;  %p184_p4 = scmp.lt.s32.totalorder %s19_s10, %s19_s10 }
   0x9   :  { %p180_p3 = scmp.ne.s32.totalorder %s19_s10, %s179_s18  ;;  %p185_p5 = scmp.lt.s32.totalorder %s179_s18, %s179_s18 }
   0xb   :  { %p186_p6 = por %p185_p5, %p184_p4 }
   0xd   :  { %p187_p7 = pnand %p186_p6, %p180_p3 }
   0xf   :  { %190 = shalt.err (!%p187_p7)
}
  0x10   :  { %21 = dma.hbm_to_vmem [thread:$0]  %s273_s0, 128, %s19_s10, [#allocation3]  }
  0x11   :  { %213 = dma.done.wait [#allocation3], 128  }
  0x12   :  { %214 = vsyncadd [#allocation3], 4294967168  ;;  %vm64_vm0 = vcmask 118784   ;;  %v47_v0 = vld [vmem:[#allocation2] sm:$0x1f]  ;;  %v51_v5 = vlaneseq  ;;  %vm109_vm9 = vcmask 114688  }
  0x13   :  { %v72_v1 = vsel %vm64_vm0, %v47_v0, -inf  ;;  %v48_v13 = vld [vmem:[%s274_s1] sm:$0x1]  ;;  %v218_v45 = vmov 0.0   ;;  %s219_s23 = smov [#allocation5]  }
  0x14   :  { %v73_v2 = vrot.slane %v72_v1, 4  ;;  %v248_v8 = vshrl.u32 %v51_v5, 7  ;;  %v52_v38 = vand.u32 127, %v51_v5  ;;  %s146_s24 = sshll.u32 %s219_s23, 4  ;;  %s147_s24 = int_to_ptr.vmem [resolvable:$true] %s146_s24 }
  0x15   :  { %s191_s25 = scalar_lea.vmem %s147_s24, 128  ;;  %p196_p9 = scmp.lt.s32.totalorder %s147_s24, %s147_s24 }
  0x16   :  { %v74_v3 = vmax.f32 %v72_v1, %v73_v2  ;;  %v60_v11 = vsub.s32 0, %v248_v8  ;;  %vm55_vm7 = vcmp.lt.s32.totalorder %v52_v38, 15  ;;  %vm131_vm10 = vcmp.eq.s32.totalorder %v248_v8, 0  ;;  %p192_p8 = scmp.ne.s32.totalorder %s147_s24, %s191_s25  ;;  %p197_p10 = scmp.lt.s32.totalorder %s191_s25, %s191_s25 }
  0x17   :  { %vm134_vm11 = vcmp.eq.s32.totalorder %v248_v8, 1 }
  0x18   :  { %v75_v4 = vrot.slane %v74_v3, 2  ;;  %v61_v15 = vrot.slane %v48_v13, %v60_v11  ;;  %p198_p11 = por %p197_p10, %p196_p9 }
  0x1a   :  { %v76_v6 = vmax.f32 %v74_v3, %v75_v4  ;;  %vm62_vm2 = vcmp.eq.s32.totalorder %v248_v8, %v61_v15  ;;  %p199_p12 = pnand %p198_p11, %p192_p8 }
  0x1b   :  { %v63_v18 = vsel %vm62_vm2, %v47_v0, 0.0 }
  0x1c   :  { %v77_v7 = vrot.slane %v76_v6, 1  ;;  %v65_v21 = vsel %vm64_vm0, %v63_v18, 0.0 }
  0x1d   :  { %v66_v25 = vrot.slane %v65_v21, 4 }
  0x1e   :  { %v78_v9 = vmax.f32 %v76_v6, %v77_v7 }
  0x1f   :  { %v67_v29 = vadd.f32 %v66_v25, %v65_v21 }
  0x20   :  { %v79_v10 = vsub.f32 %v47_v0, %v78_v9  ;;  %vm94_vm1 = vcmp.eq.f32.partialorder %v47_v0, %v78_v9 }
  0x21   :  { %v95_v14 = vsel %vm94_vm1, %v248_v8, 5  ;;  %v68_v33 = vrot.slane %v67_v29, 2 }
  0x22   :  { %v80_v12 = vmul.f32 1.442695, %v79_v10  ;;  %v96_v16 = vsel %vm64_vm0, %v95_v14, 2147483647 }
  0x23   :  { %v97_v17 = vrot.slane %v96_v16, 4  ;;  %v69_v35 = vadd.f32 %v68_v33, %v67_v29 }
  0x24   :  { %165 = vpow2.f32 %v80_v12 }
  0x25   :  { %vm98_vm3 = vcmp.lt.s32.totalorder %v96_v16, %v97_v17  ;;  %v70_v36 = vrot.slane %v69_v35, 1 }
  0x26   :  { %v99_v23 = vsel %vm98_vm3, %v96_v16, %v97_v17 }
  0x27   :  { %v100_v26 = vrot.slane %v99_v23, 2  ;;  %v71_v40 = vadd.f32 %v70_v36, %v69_v35 }
  0x29   :  { %vm101_vm4 = vcmp.lt.s32.totalorder %v99_v23, %v100_v26 }
  0x2a   :  { %v102_v32 = vsel %vm101_vm4, %v99_v23, %v100_v26 }
  0x2b   :  { %v103_v34 = vrot.slane %v102_v32, 1 }
  0x2d   :  { %vm104_vm5 = vcmp.lt.s32.totalorder %v102_v32, %v103_v34 }
  0x2e   :  { %v166_v19 = vpop.eup %165  ;;  %v105_v37 = vsel %vm104_vm5, %v102_v32, %v103_v34 }
  0x2f   :  { %v82_v20 = vsel %vm64_vm0, %v166_v19, 0.0  ;;  %vm106_vm6 = vcmp.eq.s32.totalorder %v105_v37, %v48_v13 }
  0x30   :  { %v83_v22 = vrot.slane %v82_v20, 4  ;;  %vm107_vm8 = vmand %vm55_vm7, %vm106_vm6 }
  0x31   :  { %v108_v46 = vsel %vm107_vm8, 1.0, %v218_v45 }
  0x32   :  { %v84_v24 = vadd.f32 %v83_v22, %v82_v20  ;;  %v120_v48 = vsel %vm109_vm9, %v108_v46, 0.0 }
  0x34   :  { %v85_v27 = vrot.slane %v84_v24, 2 }
  0x36   :  { %v86_v28 = vadd.f32 %v85_v27, %v84_v24 }
  0x38   :  { %v87_v30 = vrot.slane %v86_v28, 1 }
  0x3a   :  { %v88_v31 = vadd.f32 %v87_v30, %v86_v28 }
  0x3c   :  { %167 = vlog2.f32 %v88_v31 }
  0x46   :  { %v168_v39 = vpop.eup %167 }
  0x47   :  { %v90_v41 = vmul.f32 0.6931472, %v168_v39 }
  0x49   :  { %v91_v42 = vadd.f32 %v90_v41, %v78_v9 }
  0x4b   :  { %v92_v43 = vsub.f32 %v91_v42, %v71_v40 }
  0x4d   :  { %v93_v44 = vsel %vm55_vm7, %v92_v43, 0.0 }
  0x4e   :  { %v110_v47 = vsel %vm109_vm9, %v93_v44, 0.0 }
  0x4f   :  { %111 = vadd.xlane.f32.xlu0 %v110_v47 }
  0x53   :  { %121 = vadd.xlane.f32.xlu0 %v120_v48 }
  0xdc   :  { %v112_v49 = vpop.xlane.xlu0 %111 }
  0xdd   :  { %v113_v50 = vrot.slane %v112_v49, 4 }
  0xdf   :  { %v114_v51 = vadd.f32 %v113_v50, %v112_v49 }
  0xe0   :  { %v122_v52 = vpop.xlane.xlu0 %121 }
  0xe1   :  { %v115_v53 = vrot.slane %v114_v51, 2  ;;  %v123_v54 = vrot.slane %v122_v52, 4 }
  0xe3   :  { %v124_v55 = vadd.f32 %v123_v54, %v122_v52  ;;  %v116_v56 = vadd.f32 %v115_v53, %v114_v51 }
  0xe5   :  { %v125_v57 = vrot.slane %v124_v55, 2  ;;  %v117_v58 = vrot.slane %v116_v56, 1 }
  0xe7   :  { %v126_v59 = vadd.f32 %v125_v57, %v124_v55  ;;  %v118_v60 = vadd.f32 %v117_v58, %v116_v56 }
  0xe9   :  { %158 = vpush %v118_v60  ;;  %v127_v61 = vrot.slane %v126_v59, 1 }
  0xeb   :  { %v128_v62 = vadd.f32 %v127_v61, %v126_v59 }
  0xed   :  { %160 = vpush %v128_v62 }
 0x11a   :  { %s159_s1 = spop %158 }
 0x11b   :  { %v132_v63 = vstv %s159_s1 }
 0x11c   :  { %v133_v1 = vsel %vm131_vm10, %v132_v63, 0.0 }
 0x11e   :  { %s161_s22 = spop %160 }
 0x11f   :  { %v135_v0 = vstv %s161_s22 }
 0x120   :  { %v136_v2 = vsel %vm134_vm11, %v135_v0, 0.0 }
 0x121   :  { %v137_v3 = vadd.f32 %v136_v2, %v133_v1 }
 0x123   :  { %139 = vst [vmem:[#allocation5] sm:$0xff] %v137_v3 }
 0x124   :  { %202 = shalt.err (!%p199_p12)
}
 0x125   :  { %s203_s28 = scalar_lea.hbm %s275_s2, 128 }
 0x126   :  { %p204_p13 = scmp.ne.s32.totalorder %s275_s2, %s203_s28  ;;  %p207_p0 = scmp.lt.u32.totalorder %s203_s28, %s275_s2 }
 0x128   :  { %p209_p1 = pnand %p207_p0, %p204_p13 }
 0x12a   :  { %212 = shalt.err (!%p209_p1)
}
 0x12b   :  { %149 = dma.vmem_to_hbm [thread:$0]  %s147_s24, 128, %s275_s2, [#allocation4]  }
 0x12c   :  { %215 = dma.done.wait [#allocation4], 128  }
 0x12d   :  { %216 = vsyncadd [#allocation4], 4294967168 }
 0x12e   :  { %153 = vsyncpa [#allocation3], 1 }
 0x12f   :  { %154 = vsyncpa [#allocation4], 1 }

</bundles_post_ra>
